<compile_context>
chip_gen: v7x
topology: tpu7x:2x2x1
jax: 0.10.0
libtpu: 0.0.40
codegen_flags: <defaults>
</compile_context>

<pallas_src>
import functools

import jax
import jax.numpy as jnp
from jax import lax
from jax.experimental import pallas as pl
from jax.experimental.pallas import tpu as pltpu

IN_DIM = 2
HIDDEN = 10
NUM_CLASSES = 16      # small synthetic num_classes (PyTorch default is 1000)
DROP_P = 0.5          # nn.Dropout() default
LANE = 128


def _round_up(n, m):
    return ((n + m - 1) // m) * m


def _hash_mix(v):
    """Cheap murmur3-finalizer-style 32-bit mixer; uint32 in/out (VPU-only ops)."""
    v = v ^ (v >> 16)
    v = v * jnp.uint32(0x7FEB352D)
    v = v ^ (v >> 15)
    v = v * jnp.uint32(0x846CA68B)
    v = v ^ (v >> 16)
    return v


def net1_kernel(seed_ref,                        # SMEM (1,) int32  (scalar prefetch)
                x_ref,                           # VMEM (IN_DIM, TB)   batch on lanes
                w1_ref, b1_ref,                  # (H, IN_DIM), (H, 1)
                w2_ref, b2_ref,                  # (H, H),      (H, 1)
                w3_ref, b3_ref,                  # (C, H),      (C, 1)
                o_ref,                           # VMEM (C, TB)
                *, train: bool, drop_p: float):
    x = x_ref[...]                               # (IN_DIM, TB)
    tb = x.shape[1]

    # ---- fc1 + tanh: K=2 contraction as VPU broadcast-FMA ----
    w1 = w1_ref[...]                             # (H, IN_DIM)
    h = (w1[:, 0:1] * x[0:1, :] +
         w1[:, 1:2] * x[1:2, :] + b1_ref[...])   # (H, TB)
    h = jnp.tanh(h)                              # EUP

    # ---- fc2 + tanh (MXU: K=10, N=TB lane-dense) ----
    h = jnp.tanh(
        jnp.dot(w2_ref[...], h, preferred_element_type=jnp.float32) + b2_ref[...])

    # ---- Dropout(p), inverted-dropout scaling (PyTorch training mode) ----
    if train and drop_p > 0.0:
        col0 = pl.program_id(0) * tb             # global batch offset of this tile
        rows = lax.broadcasted_iota(jnp.int32, h.shape, 0)
        cols = lax.broadcasted_iota(jnp.int32, h.shape, 1) + col0
        seed = seed_ref[0]
        key = ((cols.astype(jnp.uint32) * jnp.uint32(0x9E3779B1)) ^
               (rows.astype(jnp.uint32) * jnp.uint32(0x85EBCA77)) ^
               (seed.astype(jnp.uint32) * jnp.uint32(0xC2B2AE3D)))
        bits = _hash_mix(key)                                             # uint32
        # Keep decision as a single signed-int compare on 31 uniform bits:
        # P(keep) = 1 - p, no float conversion needed.
        u31 = jnp.bitwise_and(bits, jnp.uint32(0x7FFFFFFF)).astype(jnp.int32)
        thresh = jnp.int32(int(round(drop_p * float(1 << 31))))
        keep = u31 >= thresh
        scale = jnp.float32(1.0 / (1.0 - drop_p))
        h = jnp.where(keep, h * scale, jnp.float32(0.0))

    # ---- fc3 (MXU) ----
    logits = (jnp.dot(w3_ref[...], h, preferred_element_type=jnp.float32)
              + b3_ref[...])                     # (C, TB)

    # ---- LogSoftmax over the class axis (axis 0 in this layout), numerically stable ----
    m = jnp.max(logits, axis=0, keepdims=True)
    s = logits - m
    lse = jnp.log(jnp.sum(jnp.exp(s), axis=0, keepdims=True))
    o_ref[...] = (s - lse).astype(o_ref.dtype)


def net1_forward(x, params, seed: int = 0, train: bool = True, block_b: int = 4096):
    """x: (B, IN_DIM) float32. Returns (B, num_classes) log-probabilities."""
    w1, b1, w2, b2, w3, b3 = params              # PyTorch layout: W (out, in), b (out,)
    B = x.shape[0]
    C = w3.shape[0]

    # Lane-dense batch tile (multiple of 128); bigger tiles amortize per-step overhead.
    tb = _round_up(min(block_b, max(B, 1)), LANE)
    b_pad = _round_up(B, tb)
    n_tiles = b_pad // tb

    x_t = x.T.astype(jnp.float32)                # (IN_DIM, B): batch on lanes
    if b_pad != B:
        x_t = jnp.pad(x_t, ((0, 0), (0, b_pad - B)))

    seed_arr = jnp.array([seed], dtype=jnp.int32)
    b1c, b2c, b3c = b1.reshape(-1, 1), b2.reshape(-1, 1), b3.reshape(-1, 1)

    kernel = functools.partial(net1_kernel, train=train, drop_p=DROP_P)

    full = lambda i, s: (0, 0)                   # params: DMA'd once, VMEM-resident
    tile = lambda i, s: (0, i)                   # batch-tiled along lanes

    grid_spec = pltpu.PrefetchScalarGridSpec(
        num_scalar_prefetch=1,
        grid=(n_tiles,),
        in_specs=[
            pl.BlockSpec((IN_DIM, tb), tile),
            pl.BlockSpec((HIDDEN, IN_DIM), full),
            pl.BlockSpec((HIDDEN, 1), full),
            pl.BlockSpec((HIDDEN, HIDDEN), full),
            pl.BlockSpec((HIDDEN, 1), full),
            pl.BlockSpec((C, HIDDEN), full),
            pl.BlockSpec((C, 1), full),
        ],
        out_specs=pl.BlockSpec((C, tb), tile),
    )

    flops = 2 * b_pad * (IN_DIM * HIDDEN + HIDDEN * HIDDEN + HIDDEN * C)
    transcendentals = b_pad * (2 * HIDDEN + C + 1)
    param_bytes = 4 * (HIDDEN * IN_DIM + HIDDEN + HIDDEN * HIDDEN + HIDDEN
                       + C * HIDDEN + C)
    bytes_accessed = 4 * b_pad * (IN_DIM + C) + param_bytes

    out_t = pl.pallas_call(
        kernel,
        out_shape=jax.ShapeDtypeStruct((C, b_pad), jnp.float32),
        grid_spec=grid_spec,
        compiler_params=pltpu.CompilerParams(
            dimension_semantics=("parallel",)),  # 2-TC sharding on v7x; harmless elsewhere
        cost_estimate=pl.CostEstimate(
            flops=flops, transcendentals=transcendentals,
            bytes_accessed=bytes_accessed),
    )(seed_arr, x_t, w1, b1c, w2, b2c, w3, b3c)

    # Layout plumbing back to PyTorch-style (B, C); kept outside the kernel so the
    # kernel's stores stay lane-dense.
    return out_t[:, :B].T


def init_params(key, num_classes=NUM_CLASSES):
    """PyTorch-style uniform(-1/sqrt(fan_in), 1/sqrt(fan_in)) init, PyTorch layouts."""
    def linear(k, fan_in, fan_out):
        kw, kb = jax.random.split(k)
        bound = 1.0 / jnp.sqrt(jnp.float32(fan_in))
        w = jax.random.uniform(kw, (fan_out, fan_in), jnp.float32, -bound, bound)
        b = jax.random.uniform(kb, (fan_out,), jnp.float32, -bound, bound)
        return w, b

    k1, k2, k3 = jax.random.split(key, 3)
    w1, b1 = linear(k1, IN_DIM, HIDDEN)
    w2, b2 = linear(k2, HIDDEN, HIDDEN)
    w3, b3 = linear(k3, HIDDEN, num_classes)
    return (w1, b1, w2, b2, w3, b3)


def ref_forward(x, params):
    """Pure-JAX reference of the eval-mode (dropout-off) forward pass."""
    w1, b1, w2, b2, w3, b3 = params
    h = jnp.tanh(x @ w1.T + b1)
    h = jnp.tanh(h @ w2.T + b2)
    logits = h @ w3.T + b3
    return jax.nn.log_softmax(logits, axis=-1)


if __name__ == "__main__":
    key = jax.random.PRNGKey(0)
    kx, kp = jax.random.split(key)

    B = 256                                      # two 128-lane batch tiles
    x = jax.random.normal(kx, (B, IN_DIM), dtype=jnp.float32)
    params = init_params(kp, NUM_CLASSES)

    # Eval mode (dropout off): deterministic, must match pure-JAX reference.
    out_eval = jax.block_until_ready(net1_forward(x, params, train=False, block_b=128))
    ref = ref_forward(x, params)
    assert out_eval.shape == (B, NUM_CLASSES)
    assert jnp.allclose(out_eval, ref, atol=2e-2), float(jnp.max(jnp.abs(out_eval - ref)))

    # Train mode: dropout active; rows must still be valid log-probabilities.
    out = jax.block_until_ready(net1_forward(x, params, seed=0, train=True, block_b=128))
    assert out.shape == (B, NUM_CLASSES)
    probs_sum = jnp.sum(jnp.exp(out), axis=-1)
    assert jnp.allclose(probs_sum, 1.0, atol=1e-4), probs_sum

    print("KERNEL_OK")
</pallas_src>

<mosaic_0001>
module attributes {stable_mosaic.version = 11 : i64} {
  func.func @net1_kernel(%arg0: i32, %arg1: memref<1xi32, #tpu.memory_space<smem>>, %arg2: memref<2x128xf32, #tpu.memory_space<vmem>>, %arg3: memref<10x2xf32, #tpu.memory_space<vmem>>, %arg4: memref<10x1xf32, #tpu.memory_space<vmem>>, %arg5: memref<10x10xf32, #tpu.memory_space<vmem>>, %arg6: memref<10x1xf32, #tpu.memory_space<vmem>>, %arg7: memref<16x10xf32, #tpu.memory_space<vmem>>, %arg8: memref<16x1xf32, #tpu.memory_space<vmem>>, %arg9: memref<16x128xf32, #tpu.memory_space<vmem>>) attributes {dimension_semantics = [#tpu.dimension_semantics<parallel>], iteration_bounds = array<i64: 2>, scalar_prefetch = 1 : i64, scratch_operands = 0 : i64, tpu.core_type = #tpu.core_type<tc>, window_params = [{transform_indices = @transform_0, window_bounds = array<i64: 2, 128>}, {pipeline_mode = #tpu.pipeline_mode<synchronous>, transform_indices = @transform_1, window_bounds = array<i64: 10, 2>}, {pipeline_mode = #tpu.pipeline_mode<synchronous>, transform_indices = @transform_2, window_bounds = array<i64: 10, 1>}, {pipeline_mode = #tpu.pipeline_mode<synchronous>, transform_indices = @transform_3, window_bounds = array<i64: 10, 10>}, {pipeline_mode = #tpu.pipeline_mode<synchronous>, transform_indices = @transform_4, window_bounds = array<i64: 10, 1>}, {pipeline_mode = #tpu.pipeline_mode<synchronous>, transform_indices = @transform_5, window_bounds = array<i64: 16, 10>}, {pipeline_mode = #tpu.pipeline_mode<synchronous>, transform_indices = @transform_6, window_bounds = array<i64: 16, 1>}, {transform_indices = @transform_7, window_bounds = array<i64: 16, 128>}]} {
    %c0 = arith.constant 0 : index
    %c0_0 = arith.constant 0 : index
    %0 = vector.load %arg2[%c0, %c0_0] : memref<2x128xf32, #tpu.memory_space<vmem>>, vector<2x128xf32>
    %c0_1 = arith.constant 0 : index
    %c0_2 = arith.constant 0 : index
    %1 = vector.load %arg3[%c0_1, %c0_2] : memref<10x2xf32, #tpu.memory_space<vmem>>, vector<10x2xf32>
    %2 = vector.extract_strided_slice %1 {offsets = [0, 0], sizes = [10, 1], strides = [1, 1]} : vector<10x2xf32> to vector<10x1xf32>
    %3 = vector.extract_strided_slice %0 {offsets = [0, 0], sizes = [1, 128], strides = [1, 1]} : vector<2x128xf32> to vector<1x128xf32>
    %4 = vector.broadcast %2 : vector<10x1xf32> to vector<10x128xf32>
    %5 = vector.broadcast %3 : vector<1x128xf32> to vector<10x128xf32>
    %6 = arith.mulf %4, %5 : vector<10x128xf32>
    %7 = vector.extract_strided_slice %1 {offsets = [0, 1], sizes = [10, 1], strides = [1, 1]} : vector<10x2xf32> to vector<10x1xf32>
    %8 = vector.extract_strided_slice %0 {offsets = [1, 0], sizes = [1, 128], strides = [1, 1]} : vector<2x128xf32> to vector<1x128xf32>
    %9 = vector.broadcast %7 : vector<10x1xf32> to vector<10x128xf32>
    %10 = vector.broadcast %8 : vector<1x128xf32> to vector<10x128xf32>
    %11 = arith.mulf %9, %10 : vector<10x128xf32>
    %12 = arith.addf %6, %11 : vector<10x128xf32>
    %c0_3 = arith.constant 0 : index
    %c0_4 = arith.constant 0 : index
    %13 = vector.load %arg4[%c0_3, %c0_4] : memref<10x1xf32, #tpu.memory_space<vmem>>, vector<10x1xf32>
    %14 = vector.broadcast %13 : vector<10x1xf32> to vector<10x128xf32>
    %15 = arith.addf %12, %14 : vector<10x128xf32>
    %16 = math.tanh %15 : vector<10x128xf32>
    %c0_5 = arith.constant 0 : index
    %c0_6 = arith.constant 0 : index
    %17 = vector.load %arg5[%c0_5, %c0_6] : memref<10x10xf32, #tpu.memory_space<vmem>>, vector<10x10xf32>
    %cst = arith.constant dense<0.000000e+00> : vector<10x128xf32>
    %18 = tpu.matmul %17, %16, %cst {dimension_numbers = #tpu.dot_dimension_numbers<[1], [0], [0], [1], [0, 0, 1, 1], [], []>} : vector<10x10xf32>, vector<10x128xf32>, vector<10x128xf32> -> vector<10x128xf32>
    %c0_7 = arith.constant 0 : index
    %c0_8 = arith.constant 0 : index
    %19 = vector.load %arg6[%c0_7, %c0_8] : memref<10x1xf32, #tpu.memory_space<vmem>>, vector<10x1xf32>
    %20 = vector.broadcast %19 : vector<10x1xf32> to vector<10x128xf32>
    %21 = arith.addf %18, %20 : vector<10x128xf32>
    %22 = math.tanh %21 : vector<10x128xf32>
    %c0_9 = arith.constant 0 : index
    %c0_10 = arith.constant 0 : index
    %23 = vector.load %arg7[%c0_9, %c0_10] : memref<16x10xf32, #tpu.memory_space<vmem>>, vector<16x10xf32>
    %cst_11 = arith.constant dense<0.000000e+00> : vector<16x128xf32>
    %24 = tpu.matmul %23, %22, %cst_11 {dimension_numbers = #tpu.dot_dimension_numbers<[1], [0], [0], [1], [0, 0, 1, 1], [], []>} : vector<16x10xf32>, vector<10x128xf32>, vector<16x128xf32> -> vector<16x128xf32>
    %c0_12 = arith.constant 0 : index
    %c0_13 = arith.constant 0 : index
    %25 = vector.load %arg8[%c0_12, %c0_13] : memref<16x1xf32, #tpu.memory_space<vmem>>, vector<16x1xf32>
    %26 = vector.broadcast %25 : vector<16x1xf32> to vector<16x128xf32>
    %27 = arith.addf %24, %26 : vector<16x128xf32>
    %cst_14 = arith.constant dense<0xFF800000> : vector<128xf32>
    %28 = vector.multi_reduction <maximumf>, %27, %cst_14 [0] : vector<16x128xf32> to vector<128xf32>
    %29 = vector.shape_cast %28 : vector<128xf32> to vector<1x128xf32>
    %30 = vector.broadcast %29 : vector<1x128xf32> to vector<16x128xf32>
    %31 = arith.subf %27, %30 : vector<16x128xf32>
    %32 = math.exp %31 : vector<16x128xf32>
    %cst_15 = arith.constant dense<0.000000e+00> : vector<128xf32>
    %33 = vector.multi_reduction <add>, %32, %cst_15 [0] : vector<16x128xf32> to vector<128xf32>
    %34 = vector.shape_cast %33 : vector<128xf32> to vector<1x128xf32>
    %35 = math.log %34 : vector<1x128xf32>
    %36 = vector.broadcast %35 : vector<1x128xf32> to vector<16x128xf32>
    %37 = arith.subf %31, %36 : vector<16x128xf32>
    %c0_16 = arith.constant 0 : index
    %c0_17 = arith.constant 0 : index
    %38 = vector.load %arg9[%c0_16, %c0_17] : memref<16x128xf32, #tpu.memory_space<vmem>>, vector<16x128xf32>
    tpu.vector_store %arg9[%c0_16, %c0_17], %37 {strides = array<i32>} : memref<16x128xf32, #tpu.memory_space<vmem>>, vector<16x128xf32>,
    return
  }
  func.func @transform_0(%arg0: i32, %arg1: memref<1xi32, #tpu.memory_space<smem>>) -> (i32, i32) {
    %c0_i32 = arith.constant 0 : i32
    %c0_i32_0 = arith.constant 0 : i32
    return %c0_i32, %arg0 : i32, i32
  }
  func.func @transform_1(%arg0: i32, %arg1: memref<1xi32, #tpu.memory_space<smem>>) -> (i32, i32) {
    %c0_i32 = arith.constant 0 : i32
    %c0_i32_0 = arith.constant 0 : i32
    %c0_i32_1 = arith.constant 0 : i32
    return %c0_i32, %c0_i32_0 : i32, i32
  }
  func.func @transform_2(%arg0: i32, %arg1: memref<1xi32, #tpu.memory_space<smem>>) -> (i32, i32) {
    %c0_i32 = arith.constant 0 : i32
    %c0_i32_0 = arith.constant 0 : i32
    %c0_i32_1 = arith.constant 0 : i32
    return %c0_i32, %c0_i32_0 : i32, i32
  }
  func.func @transform_3(%arg0: i32, %arg1: memref<1xi32, #tpu.memory_space<smem>>) -> (i32, i32) {
    %c0_i32 = arith.constant 0 : i32
    %c0_i32_0 = arith.constant 0 : i32
    %c0_i32_1 = arith.constant 0 : i32
    return %c0_i32, %c0_i32_0 : i32, i32
  }
  func.func @transform_4(%arg0: i32, %arg1: memref<1xi32, #tpu.memory_space<smem>>) -> (i32, i32) {
    %c0_i32 = arith.constant 0 : i32
    %c0_i32_0 = arith.constant 0 : i32
    %c0_i32_1 = arith.constant 0 : i32
    return %c0_i32, %c0_i32_0 : i32, i32
  }
  func.func @transform_5(%arg0: i32, %arg1: memref<1xi32, #tpu.memory_space<smem>>) -> (i32, i32) {
    %c0_i32 = arith.constant 0 : i32
    %c0_i32_0 = arith.constant 0 : i32
    %c0_i32_1 = arith.constant 0 : i32
    return %c0_i32, %c0_i32_0 : i32, i32
  }
  func.func @transform_6(%arg0: i32, %arg1: memref<1xi32, #tpu.memory_space<smem>>) -> (i32, i32) {
    %c0_i32 = arith.constant 0 : i32
    %c0_i32_0 = arith.constant 0 : i32
    %c0_i32_1 = arith.constant 0 : i32
    return %c0_i32, %c0_i32_0 : i32, i32
  }
  func.func @transform_7(%arg0: i32, %arg1: memref<1xi32, #tpu.memory_space<smem>>) -> (i32, i32) {
    %c0_i32 = arith.constant 0 : i32
    %c0_i32_0 = arith.constant 0 : i32
    return %c0_i32, %arg0 : i32, i32
  }
}

</mosaic_0001>

<bundles_post_ra>
// kernel: tpu_custom_call.1
= control target key start
LH: loop header
LB: loop body
LE: loop exit
PB: predicated region body
PF: predicated region fallthrough
CT: control target
= control target key end

     0   :  { %14 = vsyncpa [#allocation5], 0  ;;  %s1011_s0 = inlined_call_operand.<no memory space> [shape: s32[1], index: 0, kind: input, shape index: {}]   ;;  %s1012_s1 = inlined_call_operand.vmem [shape: f32[2,256], index: 1, kind: input, shape index: {}]   ;;  %s1013_s2 = inlined_call_operand.vmem [shape: f32[10,2], index: 2, kind: input, shape index: {}]   ;;  %s1014_s3 = inlined_call_operand.vmem [shape: f32[10,1], index: 3, kind: input, shape index: {}]   ;;  %s1015_s4 = inlined_call_operand.vmem [shape: f32[10,10], index: 4, kind: input, shape index: {}]   ;;  %s1016_s5 = inlined_call_operand.vmem [shape: f32[10,1], index: 5, kind: input, shape index: {}]   ;;  %s1017_s6 = inlined_call_operand.vmem [shape: f32[16,10], index: 6, kind: input, shape index: {}]   ;;  %s1018_s7 = inlined_call_operand.vmem [shape: f32[16,1], index: 7, kind: input, shape index: {}]   ;;  %s1019_s8 = inlined_call_operand.hbm [shape: f32[16,256], index: 8, kind: output, shape index: {}]  }
   0x1   :  { %16 = vsyncpa [#allocation5 + $0x1], 0  ;;  %s856_s26 = smov 0   ;;  %s858_s27 = smov 0  }
   0x2   :  { %s860_s28 = smov 0   ;;  %s862_s29 = smov 0  }
   0x3 LB: > { %s877_s30 = sadd.s32 4294967295, %s802_s29   ;;  %s628_s9 = sadd.s32 4294967294, %s802_s29   ;;  %s802_s29 = sphi %s862_s29, %s1027_s29   ;;  %s798_s28 = sphi %s860_s28, %s1026_s28   ;;  %s794_s27 = sphi %s858_s27, %s1025_s27   ;;  %s790_s26 = sphi %s856_s26, %s1024_s26  }
   0x4   : > { %s881_s10 = sadd.s32 1, %s802_s29   ;;  %s181_s11 = sadd.s32 1, %s798_s28 }
   0x5   : > { %s178_s12 = ssub.s32 %s802_s29, %s881_s10  ;;  %p191_p0 = scmp.ne.s32.totalorder %s798_s28, %s794_s27 }
   0x6   : > { %p179_p1 = scmp.eq.s32.totalorder %s178_s12, 0  ;;  %p192_p2 = scmp.eq.s32.totalorder %s877_s30, 1 }
   0x7   : > { %p197_p3 = scmp.ne.s32.totalorder %s794_s27, %s790_s26  ;;  %p198_p4 = scmp.eq.s32.totalorder %s628_s9, 1 }
   0x8   : > { %s892_s13 = scalar_select %p179_p1, %s798_s28, %s181_s11  }
   0x9   : > { %p894_p5 = por %p192_p2, %p191_p0  ;;  %p898_p6 = por %p198_p4, %p197_p3 }
   0xa   : > { %p631_p7 = scmp.ge.s32.totalorder %s802_s29, 1  ;;  %p241_p8 = scmp.lt.s32.totalorder %s802_s29, 3 }
   0xc   : > { %p242_p9 = pnand %p631_p7, %p241_p8 }
   0xd   : > { %v277_v0 = vld [vmem:[%s1013_s2] sm:$0xff] (!%p242_p9)  ;;  %v804_v1 = vmov (!%p242_p9), 1   ;;  %v805_v2 = vmov (!%p242_p9), 0   ;;  %v278_v3 = vld [vmem:[%s1013_s2 + $0x8] sm:$0x3] (!%p242_p9)  ;;  %vm341_vm0 = vcmask (!%p242_p9), 80896   ;;  %v289_v11 = vlaneseq (!%p242_p9) }
   0xe   : > { %245 = sbr.rel (%p242_p9) target bundleno = 693 (0x2b5), region = 48  ;;  %724 = vset.pattern.permute.xlu1 (!%p242_p9), %v804_v1  ;;  %723 = vset.pattern.permute.xlu0 (!%p242_p9), %v805_v2  ;;  %v311_v4 = vld [vmem:[%s1014_s3] sm:$0xff] (!%p242_p9)  ;;  %v312_v5 = vld [vmem:[%s1014_s3 + $0x8] sm:$0x3] (!%p242_p9)  ;;  %p272_p10 = scmp.lt.s32.totalorder (!%p242_p9), %s877_s30, 1  ;;  %vm348_vm1 = vcmask (!%p242_p9), 1041408  }
   0xf   : > { %296 = vperm.xlu1 (!%p242_p9), %724, %v277_v0   ;;  %281 = vperm.xlu0 (!%p242_p9), %723, %v277_v0   ;;  %v329_v6 = vld [vmem:[%s1016_s5] sm:$0xff] (!%p242_p9)  ;;  %v330_v7 = vld [vmem:[%s1016_s5 + $0x8] sm:$0x3] (!%p242_p9)  ;;  %v290_v12 = vshrl.u32 (!%p242_p9), %v289_v11, 7  ;;  %vm806_vm2 = vmmov (!%p242_p9), 1   ;;  %s269_s17 = sand.u32 (!%p242_p9), 1, %s794_s27  }
  0x10   : > { %v431_v8 = vld [vmem:[%s1018_s7] sm:$0xff] (!%p242_p9)  ;;  %v432_v9 = vld [vmem:[%s1018_s7 + $0x8] sm:$0xff] (!%p242_p9)  ;;  %vm937_vm3 = vmpackc.low (!%p242_p9), %vm348_vm1, %vm806_vm2  ;;  %s632_s18 = sshll.u32 (!%p242_p9), %s269_s17, 4  ;;  %s970_s24 = scalar_lea.sflag (!%p242_p9), [#allocation5], %s269_s17 }
  0x11   : > { %v327_v10 = vld [vmem:[%s1015_s4] sm:$0xff] (!%p242_p9)  ;;  %v305_v13 = vsub.s32 (!%p242_p9), 1, %v290_v12  ;;  %v291_v14 = vsub.s32 (!%p242_p9), 0, %v290_v12  ;;  %v328_v36 = vld [vmem:[%s1015_s4 + $0x8] sm:$0x3] (!%p242_p9)  ;;  %s271_s19 = scalar_lea.vmem (!%p242_p9), [#allocation4], %s632_s18 }
  0x12   : > { %656 = vmatprep.mubr.msk.f32.mxu0 (!%p242_p9), %vm341_vm0, %v327_v10  ;;  %v429_v37 = vld [vmem:[%s1017_s6] sm:$0xff] (!%p242_p9)  ;;  %v430_v47 = vld [vmem:[%s1017_s6 + $0x8] sm:$0xff] (!%p242_p9) }
  0x13   : > { %300 = vperm.xlu1 (!%p242_p9), %724, %v278_v3   ;;  %286 = vperm.xlu0 (!%p242_p9), %723, %v278_v3  }
  0x14   : > { %663 = vmatprep.mubr.msk.f32.mxu1 (!%p242_p9), %vm341_vm0, %v429_v37 }
  0x15   : > { %s273_s20 = scalar_select %p272_p10, %s877_s30, 1 }
  0x17   : > { %725 = vset.pattern.permute.xlu1 %v805_v2  ;;  %315 = vperm.xlu0 %723, %v311_v4   ;;  %s633_s21 = sshll.u32 %s273_s20, 1  ;;  %s566_s20 = sshll.u32 %s271_s19, 4  ;;  %s963_s20 = int_to_ptr.vmem [resolvable:$true] %s566_s20 }
  0x18   : > { %320 = vperm.xlu1 %725, %v312_v5   ;;  %s275_s0 = scalar_lea.vmem %s1012_s1, %s633_s21  ;;  %s641_s21 = sshll.u32 %s877_s30, 7 }
  0x19   : > { %v276_v15 = vld [vmem:[%s275_s0] sm:$0x3]  ;;  %s968_s0 = scalar_lea.hbm %s1019_s8, %s641_s21  ;;  %s740_s25 = scalar_lea.vmem %s963_s20, 256 }
  0x1a   : > { %v306_v16 = vrot.slane %v276_v15, %v305_v13  ;;  %v292_v17 = vrot.slane %v276_v15, %v291_v14  ;;  %p741_p11 = scmp.ne.s32.totalorder %s963_s20, %s740_s25  ;;  %s807_s30 = smov [#allocation4]  }
  0x1b   : > { %333 = vperm.xlu0 %723, %v329_v6   ;;  %s744_s9 = sshll.u32 %s807_s30, 4  ;;  %s745_s9 = int_to_ptr.vmem [resolvable:$false] %s744_s9 }
  0x1c   : > { %338 = vperm.xlu1 %725, %v330_v7   ;;  %p742_p12 = pnand %p741_p11, %p894_p5  ;;  %s746_s11 = scalar_lea.vmem %s745_s9, 512 }
  0x1d   : > { %p747_p0 = scmp.lt.s32.totalorder %s963_s20, %s745_s9  ;;  %p748_p1 = scmp.lt.s32.totalorder %s746_s11, %s740_s25 }
  0x1e   : > { %p743_p13 = pneg %p742_p12 }
  0x1f   : > { %435 = vperm.xlu0 %723, %v431_v8   ;;  %p749_p2 = por %p748_p1, %p747_p0 }
  0x20   : > { %440 = vperm.xlu1 %725, %v432_v9  }
  0x21   : > { %p750_p3 = pnand %p749_p2, %p743_p13 }
  0x8e   : > { %v297_v18 = vpop.permute.xlu1 %296  ;;  %v282_v19 = vpop.permute.xlu0 %281 }
  0x8f   : > { %v307_v20 = vmul.f32 %v306_v16, %v297_v18  ;;  %v293_v21 = vmul.f32 %v292_v17, %v282_v19 }
  0x91   : > { %v309_v26 = vadd.f32 %v307_v20, %v293_v21 }
  0x92   : > { %v301_v22 = vpop.permute.xlu1 %300  ;;  %v287_v23 = vpop.permute.xlu0 %286 }
  0x93   : > { %v308_v24 = vmul.f32 %v306_v16, %v301_v22  ;;  %v294_v25 = vmul.f32 %v292_v17, %v287_v23 }
  0x95   : > { %v310_v27 = vadd.f32 %v308_v24, %v294_v25 }
  0x96   : > { %v316_v28 = vpop.permute.xlu0 %315 }
  0x97   : > { %v323_v29 = vadd.f32 %v316_v28, %v309_v26  ;;  %v321_v30 = vpop.permute.xlu1 %320 }
  0x98   : > { %v324_v31 = vadd.f32 %v321_v30, %v310_v27 }
  0x99   : > { %726 = vtanh.f32 %v323_v29 }
  0x9a   : > { %728 = vtanh.f32 %v324_v31  ;;  %v334_v40 = vpop.permute.xlu0 %333 }
  0x9b   : > { %v339_v38 = vpop.permute.xlu1 %338 }
  0x9e   : > { %v436_v50 = vpop.permute.xlu0 %435 }
  0x9f   : > { %v441_v48 = vpop.permute.xlu1 %440 }
  0xa3   : > { %v727_v32 = vpop.eup %726 }
  0xa4   : > { %v729_v33 = vpop.eup %728 }
  0xa5   : > { %v666_v35 = vpack.c.bf16 %v729_v33, %v727_v32 }
  0xa7   : > { %668 = vmatprep.subr.msk.bf16.mxu0 %vm937_vm3, %v666_v35 }
  0xa8   : > { %671 = vmatpush3.bf16.msk.msra.mxu0 %vm937_vm3, %v666_v35 }
  0xab   : > { %657 = vmatmul.mubr.msk.f32.vlgmr.msra.gmra.mrb[0].mxu0 %vm341_vm0, %v328_v36 }
 0x17e   : > { %v658_v39 = vpop.f32.mrb[0].mxu0 }
 0x17f   : > { %v424_v41 = vadd.f32 %v658_v39, %v339_v38  ;;  %v418_v42 = vpop.f32.mrb[1].mxu0 }
 0x180   : > { %v419_v43 = vadd.f32 %v418_v42, %v334_v40 }
 0x181   : > { %730 = vtanh.f32 %v424_v41 }
 0x182   : > { %732 = vtanh.f32 %v419_v43 }
 0x18b   : > { %v731_v44 = vpop.eup %730 }
 0x18c   : > { %v733_v45 = vpop.eup %732 }
 0x18d   : > { %v672_v46 = vpack.c.bf16 %v731_v44, %v733_v45 }
 0x18f   : > { %674 = vmatprep.subr.msk.bf16.mxu1 %vm937_vm3, %v672_v46 }
 0x190   : > { %677 = vmatpush3.bf16.msk.msra.mxu1 %vm937_vm3, %v672_v46 }
 0x193   : > { %664 = vmatmul.mubr.msk.f32.vlgmr.msra.gmra.mrb[0].mxu1 %vm341_vm0, %v430_v47 }
 0x266   : > { %v665_v49 = vpop.f32.mrb[0].mxu1 }
 0x267   : > { %v524_v51 = vadd.f32 %v665_v49, %v441_v48  ;;  %v518_v52 = vpop.f32.mrb[1].mxu1 }
 0x268   : > { %v519_v53 = vadd.f32 %v518_v52, %v436_v50 }
 0x26a   : > { %v527_v54 = vmax.f32 %v519_v53, %v524_v51 }
 0x26c   : > { %v528_v55 = vrot.slane %v527_v54, 4 }
 0x26e   : > { %v529_v56 = vmax.f32 %v527_v54, %v528_v55 }
 0x270   : > { %v530_v57 = vrot.slane %v529_v56, 2 }
 0x272   : > { %v531_v58 = vmax.f32 %v529_v56, %v530_v57 }
 0x274   : > { %v532_v59 = vrot.slane %v531_v58, 1 }
 0x276   : > { %v533_v60 = vmax.f32 %v531_v58, %v532_v59 }
 0x278   : > { %v534_v61 = vsub.f32 %v519_v53, %v533_v60  ;;  %v535_v62 = vsub.f32 %v524_v51, %v533_v60 }
 0x27a   : > { %v536_v63 = vmul.f32 1.442695, %v534_v61  ;;  %v538_v0 = vmul.f32 1.442695, %v535_v62 }
 0x27c   : > { %734 = vpow2.f32 %v536_v63 }
 0x27d   : > { %736 = vpow2.f32 %v538_v0 }
 0x286   : > { %v735_v1 = vpop.eup %734 }
 0x287   : > { %v737_v2 = vpop.eup %736 }
 0x288   : > { %v540_v3 = vadd.f32 %v737_v2, %v735_v1 }
 0x28a   : > { %v541_v4 = vrot.slane %v540_v3, 4 }
 0x28c   : > { %v542_v5 = vadd.f32 %v541_v4, %v540_v3 }
 0x28e   : > { %v543_v6 = vrot.slane %v542_v5, 2 }
 0x290   : > { %v544_v7 = vadd.f32 %v543_v6, %v542_v5 }
 0x292   : > { %v545_v8 = vrot.slane %v544_v7, 1 }
 0x294   : > { %v546_v9 = vadd.f32 %v545_v8, %v544_v7 }
 0x296   : > { %738 = vlog2.f32 %v546_v9 }
 0x2a0   : > { %v739_v10 = vpop.eup %738 }
 0x2a1   : > { %v548_v11 = vmul.f32 0.6931472, %v739_v10 }
 0x2a3   : > { %v549_v12 = vsub.f32 %v534_v61, %v548_v11  ;;  %v550_v13 = vsub.f32 %v535_v62, %v548_v11 }
 0x2a5   : > { %551 = vst [vmem:[%s271_s19] sm:$0xff] %v549_v12  ;;  %552 = vst [vmem:[%s271_s19 + $0x8] sm:$0xff] %v550_v13 }
 0x2a6   : > { %753 = shalt.err (!%p750_p3)
}
 0x2a7   : > { %s754_s12 = scalar_lea.hbm %s968_s0, 256  ;;  %s758_s18 = scalar_lea.hbm %s1019_s8, 512 }
 0x2a8   : > { %p755_p4 = scmp.ne.s32.totalorder %s968_s0, %s754_s12  ;;  %p759_p9 = scmp.lt.u32.totalorder %s968_s0, %s1019_s8 }
 0x2a9   : > { %p760_p10 = scmp.lt.u32.totalorder %s758_s18, %s754_s12  ;;  %p762_p12 = scmp.lt.u32.totalorder %s754_s12, %s968_s0 }
 0x2aa   : > { %p756_p7 = pnand %p755_p4, %p894_p5 }
 0x2ab   : > { %p761_p11 = por %p760_p10, %p759_p9 }
 0x2ac   : > { %p757_p8 = pneg %p756_p7 }
 0x2ad   : > { %p763_p13 = por %p762_p12, %p761_p11 }
 0x2af   : > { %p764_p0 = pnand %p763_p13, %p757_p8 }
 0x2b1   : > { %767 = shalt.err (!%p764_p0)
}
 0x2b2   : > { %s808_s22 = smov 128   ;;  %s809_s23 = smov 256  }
 0x2b3   : > { %s810_s25 = smov 8  }
 0x2b4   : > { %678 = dma.vmem_to_hbm [thread:$0]  (%p894_p5), %s963_s20, 256, %s968_s0, %s970_s24, %s808_s22, %s809_s23, %s810_s25  }
 0x2b5 PF: > { %p684_p1 = scmp.ge.s32.totalorder %s802_s29, 2  ;;  %s581_s30 = sand.u32 1, %s790_s26  }
 0x2b6   : > { %s582_s9 = scalar_lea.sflag [#allocation5], %s581_s30 }
 0x2b7   : > { %p681_p2 = pnand %p684_p1, %p898_p6 }
 0x2b9   : > { %785 = dma.done.wait (!%p681_p2), %s582_s9, 256  }
 0x2ba   : > { %787 = vsyncadd (!%p681_p2), %s582_s9, 4294967040  ;;  %p19_p3 = scmp.ge.s32.totalorder %s881_s10, 4   ;;  %s1024_s26 = smov %s794_s27 }
 0x2bb   : > { %s1025_s27 = smov %s798_s28  ;;  %s1026_s28 = smov %s892_s13 }
 0x2bc   : > { %s1027_s29 = smov %s881_s10  ;;  %21 = sbr.rel (!%p19_p3) target bundleno = 3 (0x3), region = 83 }
 0x2c3   :  { %587 = vsyncpa [#allocation5], 1 }
 0x2c4   :  { %589 = vsyncpa [#allocation5 + $0x1], 1 }

</bundles_post_ra>
